<compile_context>
chip_gen: v7x
topology: tpu7x:2x2x1
jax: 0.10.0
libtpu: 0.0.40
codegen_flags: <defaults>
</compile_context>

<pallas_src>
import math

import jax
import jax.numpy as jnp
from jax import lax
from jax.experimental import pallas as pl
from jax.experimental.pallas import tpu as pltpu

# Lane-friendly shapes consistent with the module (text_dim scaled from 768 to
# 128, still divisible by num_heads=8).
TEXT_DIM = 128
NUM_HEADS = 8
HEAD_DIM = TEXT_DIM // NUM_HEADS
SEQ_LEN = 8
BATCH = 2
EPS = 1e-8            # RMSNorm eps

MAX_BN = 256          # sentences per grid step: 256*8*128*4B = 1 MiB per block
MXU_DTYPE = jnp.float32   # set to jnp.bfloat16 on v6e/v7x for ~3-4x fewer MXU
                          # passes (inference-grade ~1e-2 rel error); keep f32
                          # on v5e and for tight correctness checks.


def _sga_kernel(x_ref, pvec_ref, wq_ref, wkv_ref, wo_ref, hmask_ref, o_ref):
    E = TEXT_DIM
    x = x_ref[...]                           # (L, BN, E) f32, native layout
    L, BN, _ = x.shape

    P = pvec_ref[...]                        # (8, 2E) packed small params
    w_norm = P[0:1, :E]                      # weights / sum(weights)   (1, E)
    bq = P[1:2, :E]                          # (1, E)
    bkv = P[2:3, :]                          # (1, 2E)  [bk | bv]
    bo = P[3:4, :E]                          # (1, E)
    rmsw = P[4:5, :E]                        # (1, E)

    wdt = wq_ref.dtype                       # f32, or bf16 if MXU_DTYPE=bf16

    # Global weighted-mean query per sentence: reduce over L (leading axis) --
    # plain VALU accumulation across 8 slabs, no XLU.
    q_vec = jnp.sum(x * w_norm, axis=0)                                  # (BN, E)

    # In-projections.  K and V fused -> one (L*BN, 2E) MXU pass.
    q = jnp.dot(q_vec.astype(wdt), wq_ref[...],
                preferred_element_type=jnp.float32) + bq                 # (BN, E)
    x_flat = x.reshape(L * BN, E)
    kv = jnp.dot(x_flat.astype(wdt), wkv_ref[...],
                 preferred_element_type=jnp.float32) + bkv               # (L*BN, 2E)
    kv = kv.reshape(L, BN, 2 * E)
    k = kv[:, :, :E]                         # lane-aligned views (128-lane split)
    v = kv[:, :, E:]

    # Per-head scores: one block-diagonal matmul (1/sqrt(hd) folded into the
    # mask) reduces q*k over head_dim AND broadcasts the score to the head's
    # 16 lanes -- no per-head loops, slices, or (H, hd) reshapes.
    qk = q[None, :, :] * k                                               # (L, BN, E)
    s = jnp.dot(qk.reshape(L * BN, E).astype(wdt), hmask_ref[...],
                preferred_element_type=jnp.float32).reshape(L, BN, E)

    # Softmax over the L keys (leading axis); lanes within a head carry
    # identical scores.  Normalization is applied AFTER the V-weighting on the
    # small (BN, E) result with an exact divide (saves one full-tensor VPU
    # multiply and avoids the approx-reciprocal error).
    s_max = jnp.max(s, axis=0, keepdims=True)                            # (1, BN, E)
    p = jnp.exp(s - s_max)                                               # (L, BN, E)
    p_sum = jnp.sum(p, axis=0)                                           # (BN, E)
    attn = jnp.sum(p * v, axis=0) / p_sum                                # (BN, E)

    # Output projection, residual broadcast over L, RMSNorm.
    ctx = jnp.dot(attn.astype(wdt), wo_ref[...],
                  preferred_element_type=jnp.float32) + bo               # (BN, E)
    y = ctx[None, :, :] + x                                              # (L, BN, E)
    rms = lax.rsqrt(jnp.mean(y * y, axis=-1, keepdims=True) + EPS)
    o_ref[...] = (rmsw * (y * rms)).astype(o_ref.dtype)


def prepare_sga_params(params):
    """One-time packing of module parameters into MXU/VPU-friendly tiles.

    Call once at model-load time; the per-call wrapper then only moves
    activations (no per-call transposes / concatenates / iota construction).
    """
    E = TEXT_DIM
    w = params["weights"].astype(jnp.float32)
    w_norm = w / jnp.sum(w)                                    # pre-normalized
    in_w = params["in_proj_weight"].astype(jnp.float32)        # (3E, E) rows: q,k,v
    in_b = params["in_proj_bias"].astype(jnp.float32)          # (3E,)

    wq_t = in_w[:E].T.astype(MXU_DTYPE)                                       # (E, E)
    wkv_t = jnp.concatenate([in_w[E:2 * E].T, in_w[2 * E:].T],
                            axis=1).astype(MXU_DTYPE)                         # (E, 2E)
    wo_t = params["out_proj_weight"].astype(jnp.float32).T.astype(MXU_DTYPE)  # (E, E)

    # Pack all small per-feature vectors into one vreg-aligned (8, 2E) tile.
    pvec = jnp.zeros((8, 2 * E), jnp.float32)
    pvec = pvec.at[0, :E].set(w_norm)
    pvec = pvec.at[1, :E].set(in_b[:E])                        # bq
    pvec = pvec.at[2, :].set(in_b[E:])                         # [bk | bv]
    pvec = pvec.at[3, :E].set(params["out_proj_bias"].astype(jnp.float32))
    pvec = pvec.at[4, :E].set(params["rms_weight"].astype(jnp.float32))

    # Block-diagonal head mask with 1/sqrt(head_dim) folded in.
    head_id = jnp.arange(E) // HEAD_DIM
    hmask = (head_id[:, None] == head_id[None, :]).astype(jnp.float32)
    hmask = (hmask * (1.0 / math.sqrt(HEAD_DIM))).astype(MXU_DTYPE)

    return {"pvec": pvec, "wq_t": wq_t, "wkv_t": wkv_t, "wo_t": wo_t,
            "hmask": hmask}


def _round_up(a, m):
    return ((a + m - 1) // m) * m


def sentence_level_global_attention(text_embedding, packed):
    """text_embedding: (L, N, E) float, PyTorch (seq, batch, embed) layout.

    `packed` is the output of prepare_sga_params().  Returns (L, N, E).
    """
    L, N, E = text_embedding.shape
    assert E == TEXT_DIM and E % NUM_HEADS == 0

    x = text_embedding.astype(jnp.float32)     # consumed in native (L, N, E)

    # Choose the sentence block BN:
    #   * large enough to hit the HBM roofline (~1 MiB per block at MAX_BN),
    #   * a multiple of 8 (sublane tiling) unless it covers the whole batch,
    #   * >= 2 grid blocks whenever N >= 16 so v7x's two TensorCores both work.
    if N < 16:
        BN = N                                 # single full-batch block, no padding
    else:
        nb_target = max(2, pl.cdiv(N, MAX_BN))
        BN = min(MAX_BN, _round_up(pl.cdiv(N, nb_target), 8))
    nb = pl.cdiv(N, BN)
    n_pad = nb * BN
    if n_pad != N:                             # pad only when BN does not divide N
        x = jnp.pad(x, ((0, 0), (0, n_pad - N), (0, 0)))

    # Grid-invariant operand specs.  (They could be single-buffered via
    # pipeline_mode=pl.Buffered(1) to free ~0.35 MiB of VMEM; at BN<=256 the
    # ~12 MiB budget is well inside every generation's default scoped limit,
    # so we keep the default, more portable double buffering.)
    const2d = lambda shape: pl.BlockSpec(shape, lambda b: (0, 0))

    out = pl.pallas_call(
        _sga_kernel,
        out_shape=jax.ShapeDtypeStruct((L, n_pad, E), jnp.float32),
        grid_spec=pltpu.PrefetchScalarGridSpec(
            num_scalar_prefetch=0,
            grid=(nb,),
            in_specs=[
                pl.BlockSpec((L, BN, E), lambda b: (0, b, 0)),   # x, native layout
                const2d((8, 2 * E)),                             # packed vectors
                const2d((E, E)),                                 # Wq^T
                const2d((E, 2 * E)),                             # [Wk^T | Wv^T]
                const2d((E, E)),                                 # Wo^T
                const2d((E, E)),                                 # head mask
            ],
            out_specs=pl.BlockSpec((L, BN, E), lambda b: (0, b, 0)),
        ),
        compiler_params=pltpu.CompilerParams(
            dimension_semantics=("parallel",)),   # shard sentence blocks across cores
    )(x, packed["pvec"], packed["wq_t"], packed["wkv_t"], packed["wo_t"],
      packed["hmask"])

    if n_pad != N:
        out = out[:, :N]
    return out.astype(text_embedding.dtype)


def _reference(x_lne, params):
    """Pure-jnp replica of the PyTorch forward (eval mode, no dropout)."""
    L, N, E = x_lne.shape
    w = params["weights"]
    in_w, in_b = params["in_proj_weight"], params["in_proj_bias"]
    out_w, out_b = params["out_proj_weight"], params["out_proj_bias"]
    rms_w = params["rms_weight"]

    weighted = x_lne * w[None, None, :]
    query = jnp.sum(weighted, axis=0, keepdims=True) / jnp.sum(w)     # (1, N, E)

    q = query @ in_w[:E].T + in_b[:E]
    k = x_lne @ in_w[E:2 * E].T + in_b[E:2 * E]
    v = x_lne @ in_w[2 * E:].T + in_b[2 * E:]

    H, hd = NUM_HEADS, HEAD_DIM
    qh = q.reshape(1, N, H, hd)
    kh = k.reshape(L, N, H, hd)
    vh = v.reshape(L, N, H, hd)
    s = jnp.einsum("qnhd,knhd->nhqk", qh, kh) / math.sqrt(hd)
    p = jax.nn.softmax(s, axis=-1)
    o = jnp.einsum("nhqk,knhd->qnhd", p, vh).reshape(1, N, E)
    ctx = o @ out_w.T + out_b                                         # (1, N, E)

    y = ctx + x_lne                                                   # (L, N, E)
    rms = lax.rsqrt(jnp.mean(y * y, axis=-1, keepdims=True) + EPS)
    return rms_w * (y * rms)


if __name__ == "__main__":
    E = TEXT_DIM
    key = jax.random.PRNGKey(0)
    k1, k2, k3, k4 = jax.random.split(key, 4)

    # Deterministic parameter init (shapes from __init__; values synthetic).
    params = {
        "weights": jnp.ones((E,), jnp.float32),                  # nn.Parameter(torch.ones)
        "in_proj_weight": jax.random.normal(k1, (3 * E, E), jnp.float32) / math.sqrt(E),
        "in_proj_bias": 0.02 * jax.random.normal(k2, (3 * E,), jnp.float32),
        "out_proj_weight": jax.random.normal(k3, (E, E), jnp.float32) / math.sqrt(E),
        "out_proj_bias": jnp.zeros((E,), jnp.float32),
        "rms_weight": jnp.ones((E,), jnp.float32),                # RMSNorm weight
    }

    # One-time parameter packing (hoisted out of the per-call hot path).
    packed = prepare_sga_params(params)

    text_embedding = jax.random.normal(k4, (SEQ_LEN, BATCH, E), jnp.float32)

    out = jax.block_until_ready(sentence_level_global_attention(text_embedding, packed))
    ref = jax.block_until_ready(_reference(text_embedding, params))

    assert out.shape == (SEQ_LEN, BATCH, E)
    max_diff = float(jnp.max(jnp.abs(out - ref)))
    # Pure f32 path with exact softmax normalization -> tight tolerance again.
    assert jnp.allclose(out, ref, rtol=1e-4, atol=1e-4), f"max abs diff = {max_diff}"

    print("KERNEL_OK")
</pallas_src>

<mosaic_0001>
module attributes {stable_mosaic.version = 11 : i64} {
  func.func @_sga_kernel(%arg0: i32, %arg1: memref<8x2x128xf32, #tpu.memory_space<vmem>>, %arg2: memref<8x256xf32, #tpu.memory_space<vmem>>, %arg3: memref<128x128xf32, #tpu.memory_space<vmem>>, %arg4: memref<128x256xf32, #tpu.memory_space<vmem>>, %arg5: memref<128x128xf32, #tpu.memory_space<vmem>>, %arg6: memref<128x128xf32, #tpu.memory_space<vmem>>, %arg7: memref<8x2x128xf32, #tpu.memory_space<vmem>>) attributes {dimension_semantics = [#tpu.dimension_semantics<parallel>], iteration_bounds = array<i64: 1>, scalar_prefetch = 0 : i64, scratch_operands = 0 : i64, tpu.core_type = #tpu.core_type<tc>, window_params = [{transform_indices = @transform_0, window_bounds = array<i64: 8, 2, 128>}, {pipeline_mode = #tpu.pipeline_mode<synchronous>, transform_indices = @transform_1, window_bounds = array<i64: 8, 256>}, {pipeline_mode = #tpu.pipeline_mode<synchronous>, transform_indices = @transform_2, window_bounds = array<i64: 128, 128>}, {pipeline_mode = #tpu.pipeline_mode<synchronous>, transform_indices = @transform_3, window_bounds = array<i64: 128, 256>}, {pipeline_mode = #tpu.pipeline_mode<synchronous>, transform_indices = @transform_4, window_bounds = array<i64: 128, 128>}, {pipeline_mode = #tpu.pipeline_mode<synchronous>, transform_indices = @transform_5, window_bounds = array<i64: 128, 128>}, {transform_indices = @transform_6, window_bounds = array<i64: 8, 2, 128>}]} {
    %c0 = arith.constant 0 : index
    %c0_0 = arith.constant 0 : index
    %c0_1 = arith.constant 0 : index
    %0 = vector.load %arg1[%c0, %c0_0, %c0_1] : memref<8x2x128xf32, #tpu.memory_space<vmem>>, vector<8x2x128xf32>
    %c0_2 = arith.constant 0 : index
    %c0_3 = arith.constant 0 : index
    %1 = vector.load %arg2[%c0_2, %c0_3] : memref<8x256xf32, #tpu.memory_space<vmem>>, vector<8x256xf32>
    %2 = vector.extract_strided_slice %1 {offsets = [0, 0], sizes = [1, 128], strides = [1, 1]} : vector<8x256xf32> to vector<1x128xf32>
    %3 = vector.extract_strided_slice %1 {offsets = [1, 0], sizes = [1, 128], strides = [1, 1]} : vector<8x256xf32> to vector<1x128xf32>
    %4 = vector.extract_strided_slice %1 {offsets = [2, 0], sizes = [1, 256], strides = [1, 1]} : vector<8x256xf32> to vector<1x256xf32>
    %5 = vector.extract_strided_slice %1 {offsets = [3, 0], sizes = [1, 128], strides = [1, 1]} : vector<8x256xf32> to vector<1x128xf32>
    %6 = vector.extract_strided_slice %1 {offsets = [4, 0], sizes = [1, 128], strides = [1, 1]} : vector<8x256xf32> to vector<1x128xf32>
    %7 = vector.shape_cast %2 : vector<1x128xf32> to vector<1x1x128xf32>
    %8 = vector.broadcast %7 : vector<1x1x128xf32> to vector<8x2x128xf32>
    %9 = arith.mulf %0, %8 : vector<8x2x128xf32>
    %cst = arith.constant dense<0.000000e+00> : vector<2x128xf32>
    %10 = vector.multi_reduction <add>, %9, %cst [0] : vector<8x2x128xf32> to vector<2x128xf32>
    %c0_4 = arith.constant 0 : index
    %c0_5 = arith.constant 0 : index
    %11 = vector.load %arg3[%c0_4, %c0_5] : memref<128x128xf32, #tpu.memory_space<vmem>>, vector<128x128xf32>
    %cst_6 = arith.constant dense<0.000000e+00> : vector<2x128xf32>
    %12 = tpu.matmul %10, %11, %cst_6 {dimension_numbers = #tpu.dot_dimension_numbers<[1], [0], [0], [1], [0, 0, 1, 1], [], []>} : vector<2x128xf32>, vector<128x128xf32>, vector<2x128xf32> -> vector<2x128xf32>
    %13 = vector.broadcast %3 : vector<1x128xf32> to vector<2x128xf32>
    %14 = arith.addf %12, %13 : vector<2x128xf32>
    %15 = vector.shape_cast %0 : vector<8x2x128xf32> to vector<16x128xf32>
    %c0_7 = arith.constant 0 : index
    %c0_8 = arith.constant 0 : index
    %16 = vector.load %arg4[%c0_7, %c0_8] : memref<128x256xf32, #tpu.memory_space<vmem>>, vector<128x256xf32>
    %cst_9 = arith.constant dense<0.000000e+00> : vector<16x256xf32>
    %17 = tpu.matmul %15, %16, %cst_9 {dimension_numbers = #tpu.dot_dimension_numbers<[1], [0], [0], [1], [0, 0, 1, 1], [], []>} : vector<16x128xf32>, vector<128x256xf32>, vector<16x256xf32> -> vector<16x256xf32>
    %18 = vector.broadcast %4 : vector<1x256xf32> to vector<16x256xf32>
    %19 = arith.addf %17, %18 : vector<16x256xf32>
    %20 = vector.shape_cast %19 : vector<16x256xf32> to vector<8x2x256xf32>
    %21 = vector.extract_strided_slice %20 {offsets = [0, 0, 0], sizes = [8, 2, 128], strides = [1, 1, 1]} : vector<8x2x256xf32> to vector<8x2x128xf32>
    %22 = vector.extract_strided_slice %20 {offsets = [0, 0, 128], sizes = [8, 2, 128], strides = [1, 1, 1]} : vector<8x2x256xf32> to vector<8x2x128xf32>
    %23 = vector.shape_cast %14 : vector<2x128xf32> to vector<1x2x128xf32>
    %24 = vector.broadcast %23 : vector<1x2x128xf32> to vector<8x2x128xf32>
    %25 = arith.mulf %24, %21 : vector<8x2x128xf32>
    %26 = vector.shape_cast %25 : vector<8x2x128xf32> to vector<16x128xf32>
    %c0_10 = arith.constant 0 : index
    %c0_11 = arith.constant 0 : index
    %27 = vector.load %arg6[%c0_10, %c0_11] : memref<128x128xf32, #tpu.memory_space<vmem>>, vector<128x128xf32>
    %cst_12 = arith.constant dense<0.000000e+00> : vector<16x128xf32>
    %28 = tpu.matmul %26, %27, %cst_12 {dimension_numbers = #tpu.dot_dimension_numbers<[1], [0], [0], [1], [0, 0, 1, 1], [], []>} : vector<16x128xf32>, vector<128x128xf32>, vector<16x128xf32> -> vector<16x128xf32>
    %29 = vector.shape_cast %28 : vector<16x128xf32> to vector<8x2x128xf32>
    %cst_13 = arith.constant dense<0xFF800000> : vector<2x128xf32>
    %30 = vector.multi_reduction <maximumf>, %29, %cst_13 [0] : vector<8x2x128xf32> to vector<2x128xf32>
    %31 = vector.shape_cast %30 : vector<2x128xf32> to vector<1x2x128xf32>
    %32 = vector.broadcast %31 : vector<1x2x128xf32> to vector<8x2x128xf32>
    %33 = arith.subf %29, %32 : vector<8x2x128xf32>
    %34 = math.exp %33 : vector<8x2x128xf32>
    %cst_14 = arith.constant dense<0.000000e+00> : vector<2x128xf32>
    %35 = vector.multi_reduction <add>, %34, %cst_14 [0] : vector<8x2x128xf32> to vector<2x128xf32>
    %36 = arith.mulf %34, %22 : vector<8x2x128xf32>
    %cst_15 = arith.constant dense<0.000000e+00> : vector<2x128xf32>
    %37 = vector.multi_reduction <add>, %36, %cst_15 [0] : vector<8x2x128xf32> to vector<2x128xf32>
    %38 = arith.divf %37, %35 : vector<2x128xf32>
    %c0_16 = arith.constant 0 : index
    %c0_17 = arith.constant 0 : index
    %39 = vector.load %arg5[%c0_16, %c0_17] : memref<128x128xf32, #tpu.memory_space<vmem>>, vector<128x128xf32>
    %cst_18 = arith.constant dense<0.000000e+00> : vector<2x128xf32>
    %40 = tpu.matmul %38, %39, %cst_18 {dimension_numbers = #tpu.dot_dimension_numbers<[1], [0], [0], [1], [0, 0, 1, 1], [], []>} : vector<2x128xf32>, vector<128x128xf32>, vector<2x128xf32> -> vector<2x128xf32>
    %41 = vector.broadcast %5 : vector<1x128xf32> to vector<2x128xf32>
    %42 = arith.addf %40, %41 : vector<2x128xf32>
    %43 = vector.shape_cast %42 : vector<2x128xf32> to vector<1x2x128xf32>
    %44 = vector.broadcast %43 : vector<1x2x128xf32> to vector<8x2x128xf32>
    %45 = arith.addf %44, %0 : vector<8x2x128xf32>
    %46 = arith.mulf %45, %45 : vector<8x2x128xf32>
    %cst_19 = arith.constant dense<0.000000e+00> : vector<8x2xf32>
    %47 = vector.multi_reduction <add>, %46, %cst_19 [2] : vector<8x2x128xf32> to vector<8x2xf32>
    %48 = vector.shape_cast %47 : vector<8x2xf32> to vector<8x2x1xf32>
    %cst_20 = arith.constant 1.280000e+02 : f32
    %49 = vector.broadcast %cst_20 : f32 to vector<8x2x1xf32>
    %50 = arith.divf %48, %49 : vector<8x2x1xf32>
    %cst_21 = arith.constant 9.99999993E-9 : f32
    %51 = vector.broadcast %cst_21 : f32 to vector<8x2x1xf32>
    %52 = arith.addf %50, %51 : vector<8x2x1xf32>
    %53 = math.rsqrt %52 : vector<8x2x1xf32>
    %54 = vector.broadcast %53 : vector<8x2x1xf32> to vector<8x2x128xf32>
    %55 = arith.mulf %45, %54 : vector<8x2x128xf32>
    %56 = vector.shape_cast %6 : vector<1x128xf32> to vector<1x1x128xf32>
    %57 = vector.broadcast %56 : vector<1x1x128xf32> to vector<8x2x128xf32>
    %58 = arith.mulf %57, %55 : vector<8x2x128xf32>
    %c0_22 = arith.constant 0 : index
    %c0_23 = arith.constant 0 : index
    %c0_24 = arith.constant 0 : index
    %59 = vector.load %arg7[%c0_22, %c0_23, %c0_24] : memref<8x2x128xf32, #tpu.memory_space<vmem>>, vector<8x2x128xf32>
    tpu.vector_store %arg7[%c0_22, %c0_23, %c0_24], %58 {strides = array<i32>} : memref<8x2x128xf32, #tpu.memory_space<vmem>>, vector<8x2x128xf32>,
    return
  }
  func.func @transform_0(%arg0: i32) -> (i32, i32, i32) {
    %c0_i32 = arith.constant 0 : i32
    %c0_i32_0 = arith.constant 0 : i32
    %c0_i32_1 = arith.constant 0 : i32
    return %c0_i32, %arg0, %c0_i32_0 : i32, i32, i32
  }
  func.func @transform_1(%arg0: i32) -> (i32, i32) {
    %c0_i32 = arith.constant 0 : i32
    %c0_i32_0 = arith.constant 0 : i32
    %c0_i32_1 = arith.constant 0 : i32
    return %c0_i32, %c0_i32_0 : i32, i32
  }
  func.func @transform_2(%arg0: i32) -> (i32, i32) {
    %c0_i32 = arith.constant 0 : i32
    %c0_i32_0 = arith.constant 0 : i32
    %c0_i32_1 = arith.constant 0 : i32
    return %c0_i32, %c0_i32_0 : i32, i32
  }
  func.func @transform_3(%arg0: i32) -> (i32, i32) {
    %c0_i32 = arith.constant 0 : i32
    %c0_i32_0 = arith.constant 0 : i32
    %c0_i32_1 = arith.constant 0 : i32
    return %c0_i32, %c0_i32_0 : i32, i32
  }
  func.func @transform_4(%arg0: i32) -> (i32, i32) {
    %c0_i32 = arith.constant 0 : i32
    %c0_i32_0 = arith.constant 0 : i32
    %c0_i32_1 = arith.constant 0 : i32
    return %c0_i32, %c0_i32_0 : i32, i32
  }
  func.func @transform_5(%arg0: i32) -> (i32, i32) {
    %c0_i32 = arith.constant 0 : i32
    %c0_i32_0 = arith.constant 0 : i32
    %c0_i32_1 = arith.constant 0 : i32
    return %c0_i32, %c0_i32_0 : i32, i32
  }
  func.func @transform_6(%arg0: i32) -> (i32, i32, i32) {
    %c0_i32 = arith.constant 0 : i32
    %c0_i32_0 = arith.constant 0 : i32
    %c0_i32_1 = arith.constant 0 : i32
    return %c0_i32, %arg0, %c0_i32_0 : i32, i32, i32
  }
}

</mosaic_0001>

<bundles_post_ra>
// kernel: tpu_custom_call.1
= control target key start
LH: loop header
LB: loop body
LE: loop exit
PB: predicated region body
PF: predicated region fallthrough
CT: control target
= control target key end

     0   :  { %11 = vsyncpa [#allocation3], 0  ;;  %s1790_s0 = inlined_call_operand.hbm [shape: f32[8,2,128], index: 0, kind: input, shape index: {}]   ;;  %s1791_s1 = inlined_call_operand.hbm [shape: f32[8,256], index: 1, kind: input, shape index: {}]   ;;  %s1792_s2 = inlined_call_operand.hbm [shape: f32[128,128], index: 2, kind: input, shape index: {}]   ;;  %s1793_s3 = inlined_call_operand.hbm [shape: f32[128,256], index: 3, kind: input, shape index: {}]   ;;  %s1794_s4 = inlined_call_operand.hbm [shape: f32[128,128], index: 4, kind: input, shape index: {}]   ;;  %s1795_s5 = inlined_call_operand.hbm [shape: f32[128,128], index: 5, kind: input, shape index: {}]   ;;  %s1796_s6 = inlined_call_operand.hbm [shape: f32[8,2,128], index: 6, kind: output, shape index: {}]  }
   0x1   :  { %12 = vsyncpa [#allocation6], 0 }
   0x2   :  { %13 = vsyncpa [#allocation9], 0 }
   0x3   :  { %14 = vsyncpa [#allocation12], 0 }
   0x4   :  { %15 = vsyncpa [#allocation4], 0  ;;  %s1410_s21 = smov [#allocation5]   ;;  %s1411_s23 = smov [#allocation8]  }
   0x5   :  { %s34_s22 = sshll.u32 %s1410_s21, 4  ;;  %s55_s24 = sshll.u32 %s1411_s23, 4  ;;  %s35_s22 = int_to_ptr.vmem [resolvable:$true] %s34_s22  ;;  %s1462_s24 = int_to_ptr.vmem [resolvable:$true] %s55_s24 }
   0x6   :  { %s1246_s27 = scalar_lea.hbm %s1791_s1, 256 }
   0x7   :  { %p1247_p0 = scmp.ne.s32.totalorder %s1791_s1, %s1246_s27  ;;  %p1250_p1 = scmp.lt.u32.totalorder %s1246_s27, %s1791_s1 }
   0x9   :  { %p1252_p2 = pnand %p1250_p1, %p1247_p0 }
   0xb   :  { %1255 = shalt.err (!%p1252_p2)
}
   0xc   :  { %s1256_s8 = scalar_lea.vmem %s35_s22, 256  ;;  %p1261_p4 = scmp.lt.s32.totalorder %s35_s22, %s35_s22 }
   0xd   :  { %p1257_p3 = scmp.ne.s32.totalorder %s35_s22, %s1256_s8  ;;  %p1262_p5 = scmp.lt.s32.totalorder %s1256_s8, %s1256_s8 }
   0xf   :  { %p1263_p6 = por %p1262_p5, %p1261_p4 }
  0x11   :  { %p1264_p7 = pnand %p1263_p6, %p1257_p3 }
  0x13   :  { %1267 = shalt.err (!%p1264_p7)
}
  0x14   :  { %37 = dma.hbm_to_vmem [thread:$0]  %s1791_s1, 256, %s35_s22, [#allocation6]  }
  0x15   :  { %s1268_s13 = scalar_lea.hbm %s1793_s3, 4096 }
  0x16   :  { %p1269_p8 = scmp.ne.s32.totalorder %s1793_s3, %s1268_s13  ;;  %p1272_p9 = scmp.lt.u32.totalorder %s1268_s13, %s1793_s3 }
  0x18   :  { %p1274_p10 = pnand %p1272_p9, %p1269_p8 }
  0x1a   :  { %1277 = shalt.err (!%p1274_p10)
}
  0x1b   :  { %s1278_s18 = scalar_lea.vmem %s1462_s24, 4096  ;;  %p1283_p12 = scmp.lt.s32.totalorder %s1462_s24, %s1462_s24 }
  0x1c   :  { %p1279_p11 = scmp.ne.s32.totalorder %s1462_s24, %s1278_s18  ;;  %p1284_p13 = scmp.lt.s32.totalorder %s1278_s18, %s1278_s18 }
  0x1e   :  { %p1285_p0 = por %p1284_p13, %p1283_p12 }
  0x20   :  { %p1286_p1 = pnand %p1285_p0, %p1279_p11 }
  0x22   :  { %1289 = shalt.err (!%p1286_p1)
}
  0x23   :  { %s1412_s1 = smov 256   ;;  %s1413_s19 = smov 16  }
  0x24   :  { %61 = dma.hbm_to_vmem [thread:$0]  %s1793_s3, 4096, %s1462_s24, [#allocation9], %s1412_s1, %s1412_s1, %s1413_s19  }
  0x25   :  { %s1414_s22 = smov [#allocation2]   ;;  %s1290_s27 = scalar_lea.hbm %s1790_s0, 256 }
  0x26   :  { %s21_s23 = sshll.u32 %s1414_s22, 4  ;;  %p1291_p2 = scmp.ne.s32.totalorder %s1790_s0, %s1290_s27  ;;  %s22_s23 = int_to_ptr.vmem [resolvable:$true] %s21_s23 }
  0x27   :  { %p1294_p3 = scmp.lt.u32.totalorder %s1290_s27, %s1790_s0 }
  0x29   :  { %p1296_p4 = pnand %p1294_p3, %p1291_p2 }
  0x2b   :  { %1299 = shalt.err (!%p1296_p4)
}
  0x2c   :  { %s1300_s8 = scalar_lea.vmem %s22_s23, 256  ;;  %p1305_p6 = scmp.lt.s32.totalorder %s22_s23, %s22_s23 }
  0x2d   :  { %p1301_p5 = scmp.ne.s32.totalorder %s22_s23, %s1300_s8  ;;  %p1306_p7 = scmp.lt.s32.totalorder %s1300_s8, %s1300_s8 }
  0x2f   :  { %p1307_p8 = por %p1306_p7, %p1305_p6 }
  0x31   :  { %p1308_p9 = pnand %p1307_p8, %p1301_p5 }
  0x33   :  { %1311 = shalt.err (!%p1308_p9)
}
  0x34   :  { %s1415_s3 = smov 32   ;;  %s1416_s24 = smov 2  }
  0x35   :  { %27 = dma.hbm_to_vmem [thread:$0]  %s1790_s0, 256, %s22_s23, [#allocation3], %s1415_s3, %s1415_s3, %s1416_s24  }
  0x36   :  { %s1417_s11 = smov [#allocation7]   ;;  %s1312_s15 = scalar_lea.hbm %s1792_s2, 2048 }
  0x37   :  { %s43_s12 = sshll.u32 %s1417_s11, 4  ;;  %p1313_p10 = scmp.ne.s32.totalorder %s1792_s2, %s1312_s15  ;;  %s44_s12 = int_to_ptr.vmem [resolvable:$true] %s43_s12 }
  0x38   :  { %p1316_p11 = scmp.lt.u32.totalorder %s1312_s15, %s1792_s2 }
  0x3a   :  { %p1318_p12 = pnand %p1316_p11, %p1313_p10 }
  0x3c   :  { %1321 = shalt.err (!%p1318_p12)
}
  0x3d   :  { %s1322_s19 = scalar_lea.vmem %s44_s12, 2048  ;;  %p1327_p0 = scmp.lt.s32.totalorder %s44_s12, %s44_s12 }
  0x3e   :  { %p1323_p13 = scmp.ne.s32.totalorder %s44_s12, %s1322_s19  ;;  %p1328_p1 = scmp.lt.s32.totalorder %s1322_s19, %s1322_s19 }
  0x40   :  { %p1329_p2 = por %p1328_p1, %p1327_p0 }
  0x42   :  { %p1330_p3 = pnand %p1329_p2, %p1323_p13 }
  0x44   :  { %1333 = shalt.err (!%p1330_p3)
}
  0x45   :  { %s1418_s0 = smov 128   ;;  %s1419_s20 = smov 8  }
  0x46   :  { %49 = dma.hbm_to_vmem [thread:$0]  %s1792_s2, 2048, %s44_s12, [#allocation6], %s1418_s0, %s1418_s0, %s1419_s20  }
  0x47   :  { %s1420_s23 = smov [#allocation10]   ;;  %s1421_s26 = smov [#allocation11]  }
  0x48   :  { %s67_s25 = sshll.u32 %s1420_s23, 4  ;;  %s79_s27 = sshll.u32 %s1421_s26, 4  ;;  %s68_s25 = int_to_ptr.vmem [resolvable:$true] %s67_s25  ;;  %s1523_s27 = int_to_ptr.vmem [resolvable:$true] %s79_s27 }
  0x49   :  { %s1334_s30 = scalar_lea.hbm %s1794_s4, 2048 }
  0x4a   :  { %p1335_p4 = scmp.ne.s32.totalorder %s1794_s4, %s1334_s30  ;;  %p1338_p5 = scmp.lt.u32.totalorder %s1334_s30, %s1794_s4 }
  0x4c   :  { %p1340_p6 = pnand %p1338_p5, %p1335_p4 }
  0x4e   :  { %1343 = shalt.err (!%p1340_p6)
}
  0x4f   :  { %s1344_s2 = scalar_lea.vmem %s68_s25, 2048  ;;  %p1349_p8 = scmp.lt.s32.totalorder %s68_s25, %s68_s25 }
  0x50   :  { %p1345_p7 = scmp.ne.s32.totalorder %s68_s25, %s1344_s2  ;;  %p1350_p9 = scmp.lt.s32.totalorder %s1344_s2, %s1344_s2 }
  0x52   :  { %p1351_p10 = por %p1350_p9, %p1349_p8 }
  0x54   :  { %p1352_p11 = pnand %p1351_p10, %p1345_p7 }
  0x56   :  { %1355 = shalt.err (!%p1352_p11)
}
  0x57   :  { %73 = dma.hbm_to_vmem [thread:$0]  %s1794_s4, 2048, %s68_s25, [#allocation9], %s1418_s0, %s1418_s0, %s1419_s20  }
  0x58   :  { %s1356_s15 = scalar_lea.hbm %s1795_s5, 2048 }
  0x59   :  { %p1357_p12 = scmp.ne.s32.totalorder %s1795_s5, %s1356_s15  ;;  %p1360_p13 = scmp.lt.u32.totalorder %s1356_s15, %s1795_s5 }
  0x5b   :  { %p1362_p0 = pnand %p1360_p13, %p1357_p12 }
  0x5d   :  { %1365 = shalt.err (!%p1362_p0)
}
  0x5e   :  { %s1366_s19 = scalar_lea.vmem %s1523_s27, 2048  ;;  %p1371_p2 = scmp.lt.s32.totalorder %s1523_s27, %s1523_s27 }
  0x5f   :  { %p1367_p1 = scmp.ne.s32.totalorder %s1523_s27, %s1366_s19  ;;  %p1372_p3 = scmp.lt.s32.totalorder %s1366_s19, %s1366_s19 }
  0x61   :  { %p1373_p4 = por %p1372_p3, %p1371_p2 }
  0x63   :  { %p1374_p5 = pnand %p1373_p4, %p1367_p1 }
  0x65   :  { %1377 = shalt.err (!%p1374_p5)
}
  0x66   :  { %85 = dma.hbm_to_vmem [thread:$0]  %s1795_s5, 2048, %s1523_s27, [#allocation12], %s1418_s0, %s1418_s0, %s1419_s20  }
  0x67   :  { %1400 = dma.done.wait [#allocation3], 256  }
  0x68   :  { %1401 = vsyncadd [#allocation3], 4294967040 }
  0x69   :  { %1402 = dma.done.wait [#allocation6], 2304  }
  0x6a   :  { %1403 = vsyncadd [#allocation6], 4294964992 }
  0x6b   :  { %1404 = dma.done.wait [#allocation9], 6144  }
  0x6c   :  { %1405 = vsyncadd [#allocation9], 4294961152 }
  0x6d   :  { %1406 = dma.done.wait [#allocation12], 2048  }
  0x6e   :  { %1407 = vsyncadd [#allocation12], 4294965248  ;;  %v1422_v0 = vmov 0.0|0.0   ;;  %v1423_v1 = vmov 0.0   ;;  %vm1424_vm0 = vmmov 0   ;;  %v233_v2 = vld [vmem:[#allocation8 + $0x8] sm:$0xff]  ;;  %v114_v24 = vlaneseq }
  0x6f   :  { %1083 = vmatprep.subr.bf16.mxu0 %v1422_v0  ;;  %380 = vmatprep.mubr.f32.mxu1 %v1423_v1  ;;  %v235_v3 = vld [vmem:[#allocation8 + $0x18] sm:$0xff]  ;;  %v232_v4 = vld [vmem:[#allocation8] sm:$0xff]  ;;  %v234_v6 = vld [vmem:[#allocation8 + $0x10] sm:$0xff]  ;;  %v1425_v41 = vmov 1983009808   ;;  %vm126_vm1 = vcmask 1041408  }
  0x70   :  { %1010 = vmatprep.mubr.msk.f32.mxu0 %vm1424_vm0, %v1423_v1  ;;  %v1107_v5 = vpack.c.bf16 %v235_v3, %v233_v2  ;;  %v237_v7 = vld [vmem:[#allocation8 + $0x28] sm:$0xff]  ;;  %v239_v8 = vld [vmem:[#allocation8 + $0x38] sm:$0xff]  ;;  %v1109_v9 = vpack.c.bf16 %v234_v6, %v232_v4  ;;  %v236_v11 = vld [vmem:[#allocation8 + $0x20] sm:$0xff]  ;;  %v1565_v34 = vshrl.u32 %v114_v24, 7  ;;  %v283_v42 = vunpack.c.l.s4 %v1425_v41  ;;  %s1426_s5 = smov [#allocation13]  }
  0x71   :  { %v1111_v10 = vpack.c.bf16 %v239_v8, %v237_v7  ;;  %v238_v12 = vld [vmem:[#allocation8 + $0x30] sm:$0xff]  ;;  %v142_v13 = vld [vmem:[#allocation7] sm:$0xff]  ;;  %v143_v14 = vld [vmem:[#allocation7 + $0x8] sm:$0xff]  ;;  %s911_s0 = sshll.u32 %s1426_s5, 4  ;;  %s912_s0 = int_to_ptr.vmem [resolvable:$true] %s911_s0 }
  0x72   :  { %1108 = vmatprep.subr.bf16.mxu1 %v1107_v5  ;;  %v241_v15 = vld [vmem:[#allocation8 + $0x48] sm:$0xff]  ;;  %v243_v16 = vld [vmem:[#allocation8 + $0x58] sm:$0xff]  ;;  %v1113_v17 = vpack.c.bf16 %v238_v12, %v236_v11  ;;  %v1084_v18 = vpack.c.bf16 %v143_v14, %v142_v13  ;;  %v144_v19 = vld [vmem:[#allocation7 + $0x10] sm:$0xff]  ;;  %v116_v46 = vsub.s32 0, %v1565_v34  ;;  %v284_v59 = vunpack.c.0.s8 %v283_v42  ;;  %s1378_s20 = scalar_lea.vmem %s912_s0, 256  ;;  %p1383_p7 = scmp.lt.s32.totalorder %s912_s0, %s912_s0 }
  0x73   :  { %1110 = vmatpush1.bf16.msra.mxu1 %v1109_v9  ;;  %v1115_v20 = vpack.c.bf16 %v243_v16, %v241_v15  ;;  %v240_v21 = vld [vmem:[#allocation8 + $0x40] sm:$0xff]  ;;  %v242_v22 = vld [vmem:[#allocation8 + $0x50] sm:$0xff]  ;;  %v145_v23 = vld [vmem:[#allocation7 + $0x18] sm:$0xff]  ;;  %p1379_p6 = scmp.ne.s32.totalorder %s912_s0, %s1378_s20  ;;  %p1384_p8 = scmp.lt.s32.totalorder %s1378_s20, %s1378_s20 }
  0x74   :  { %1112 = vmatprep.subr.bf16.mxu1 %v1111_v10  ;;  %1085 = vmatpush3.bf16.msra.mxu0 %v1084_v18  ;;  %v1087_v25 = vpack.c.bf16 %v145_v23, %v144_v19  ;;  %v245_v26 = vld [vmem:[#allocation8 + $0x68] sm:$0xff]  ;;  %v247_v27 = vld [vmem:[#allocation8 + $0x78] sm:$0xff]  ;;  %v146_v28 = vld [vmem:[#allocation7 + $0x20] sm:$0xff]  ;;  %v1117_v30 = vpack.c.bf16 %v242_v22, %v240_v21  ;;  %v1589_v13 = vsub.s32 %v284_v59, %v1565_v34 }
  0x75   :  { %1086 = vmatprep.subr.bf16.mxu0 %v1422_v0  ;;  %v147_v29 = vld [vmem:[#allocation7 + $0x28] sm:$0xff]  ;;  %v1119_v31 = vpack.c.bf16 %v247_v27, %v245_v26  ;;  %v244_v32 = vld [vmem:[#allocation8 + $0x60] sm:$0xff]  ;;  %v246_v33 = vld [vmem:[#allocation8 + $0x70] sm:$0xff]  ;;  %p1385_p9 = por %p1384_p8, %p1383_p7 }
  0x76   :  { %v1090_v35 = vpack.c.bf16 %v147_v29, %v146_v28  ;;  %v249_v36 = vld [vmem:[#allocation8 + $0x88] sm:$0xff]  ;;  %v251_v37 = vld [vmem:[#allocation8 + $0x98] sm:$0xff]  ;;  %v148_v38 = vld [vmem:[#allocation7 + $0x30] sm:$0xff]  ;;  %v1121_v40 = vpack.c.bf16 %v246_v33, %v244_v32 }
  0x77   :  { %1114 = vmatpush1.bf16.msra.mxu1 %v1113_v17  ;;  %v149_v39 = vld [vmem:[#allocation7 + $0x38] sm:$0xff]  ;;  %v1123_v43 = vpack.c.bf16 %v251_v37, %v249_v36  ;;  %v248_v44 = vld [vmem:[#allocation8 + $0x80] sm:$0xff]  ;;  %v250_v45 = vld [vmem:[#allocation8 + $0x90] sm:$0xff]  ;;  %p1386_p10 = pnand %p1385_p9, %p1379_p6 }
  0x78   :  { %1116 = vmatprep.subr.bf16.mxu1 %v1115_v20  ;;  %1088 = vmatpush3.bf16.msra.mxu0 %v1087_v25  ;;  %v1093_v47 = vpack.c.bf16 %v149_v39, %v148_v38  ;;  %v253_v48 = vld [vmem:[#allocation8 + $0xa8] sm:$0xff]  ;;  %v255_v49 = vld [vmem:[#allocation8 + $0xb8] sm:$0xff]  ;;  %v150_v50 = vld [vmem:[#allocation7 + $0x40] sm:$0xff]  ;;  %v1125_v55 = vpack.c.bf16 %v250_v45, %v248_v44 }
  0x79   :  { %1089 = vmatprep.subr.bf16.mxu0 %v1422_v0  ;;  %v252_v51 = vld [vmem:[#allocation8 + $0xa0] sm:$0xff]  ;;  %v151_v52 = vld [vmem:[#allocation7 + $0x48] sm:$0xff]  ;;  %v1578_v58 = vld [vmem:[#allocation5] sm:$0xff]  ;;  %v1127_v60 = vpack.c.bf16 %v255_v49, %v253_v48 }
  0x7a   :  { %v1570_v53 = vld [vmem:[#allocation2] sm:$0x3]  ;;  %v1572_v54 = vld [vmem:[#allocation2 + $0x2] sm:$0x3]  ;;  %v1574_v56 = vld [vmem:[#allocation2 + $0x4] sm:$0x3]  ;;  %v117_v2 = vrot.slane %v1578_v58, %v116_v46  ;;  %v1096_v3 = vpack.c.bf16 %v151_v52, %v150_v50 }
  0x7b   :  { %1118 = vmatpush1.bf16.msra.mxu1 %v1117_v30  ;;  %v1576_v57 = vld [vmem:[#allocation2 + $0x6] sm:$0x3]  ;;  %v254_v61 = vld [vmem:[#allocation8 + $0xb0] sm:$0xff]  ;;  %v257_v62 = vld [vmem:[#allocation8 + $0xc8] sm:$0xff]  ;;  %v280_v25 = vcombine.low %v1570_v53, %v1572_v54 }
  0x7c   :  { %1120 = vmatprep.subr.bf16.mxu1 %v1119_v31  ;;  %1091 = vmatpush3.bf16.msra.mxu0 %v1090_v35  ;;  %v259_v63 = vld [vmem:[#allocation8 + $0xd8] sm:$0xff]  ;;  %v1581_v4 = vld [vmem:[#allocation2 + $0x8] sm:$0x3]  ;;  %v152_v5 = vld [vmem:[#allocation7 + $0x50] sm:$0xff]  ;;  %v118_v7 = vmul.f32 %v117_v2, %v1570_v53  ;;  %v119_v8 = vmul.f32 %v117_v2, %v1572_v54  ;;  %v120_v9 = vmul.f32 %v117_v2, %v1574_v56 }
  0x7d   :  { %1092 = vmatprep.subr.bf16.mxu0 %v1422_v0  ;;  %v153_v6 = vld [vmem:[#allocation7 + $0x58] sm:$0xff]  ;;  %v121_v10 = vmul.f32 %v117_v2, %v1576_v57  ;;  %v1129_v11 = vpack.c.bf16 %v254_v61, %v252_v51  ;;  %v1131_v12 = vpack.c.bf16 %v259_v63, %v257_v62  ;;  %v1591_v14 = vld [vmem:[#allocation2 + $0xa] sm:$0x3]  ;;  %v256_v15 = vld [vmem:[#allocation8 + $0xc0] sm:$0xff]  ;;  %v122_v20 = vmul.f32 %v117_v2, %v1581_v4 }
  0x7e   :  { %v258_v16 = vld [vmem:[#allocation8 + $0xd0] sm:$0xff]  ;;  %v127_v17 = vsel %vm126_vm1, %v118_v7, 0.0  ;;  %v128_v18 = vsel %vm126_vm1, %v119_v8, 0.0  ;;  %v130_v19 = vsel %vm126_vm1, %v120_v9, 0.0  ;;  %v1099_v21 = vpack.c.bf16 %v153_v6, %v152_v5  ;;  %v261_v22 = vld [vmem:[#allocation8 + $0xe8] sm:$0xff]  ;;  %v263_v23 = vld [vmem:[#allocation8 + $0xf8] sm:$0xff] }
  0x7f   :  { %1122 = vmatpush1.bf16.msra.mxu1 %v1121_v40  ;;  %v129_v24 = vadd.f32 %v128_v18, %v127_v17  ;;  %v281_v26 = vcombine.low %v1574_v56, %v1576_v57  ;;  %v1601_v27 = vld [vmem:[#allocation2 + $0xc] sm:$0x3]  ;;  %v154_v28 = vld [vmem:[#allocation7 + $0x60] sm:$0xff]  ;;  %v123_v30 = vmul.f32 %v117_v2, %v1591_v14  ;;  %v132_v31 = vsel %vm126_vm1, %v121_v10, 0.0  ;;  %v1606_v33 = vld [vmem:[#allocation2 + $0xe] sm:$0x3] }
  0x80   :  { %1124 = vmatprep.subr.bf16.mxu1 %v1123_v43  ;;  %1094 = vmatpush3.bf16.msra.mxu0 %v1093_v47  ;;  %v155_v29 = vld [vmem:[#allocation7 + $0x68] sm:$0xff]  ;;  %v1133_v32 = vpack.c.bf16 %v258_v16, %v256_v15  ;;  %v1135_v36 = vpack.c.bf16 %v263_v23, %v261_v22  ;;  %v260_v37 = vld [vmem:[#allocation8 + $0xe0] sm:$0xff]  ;;  %v262_v38 = vld [vmem:[#allocation8 + $0xf0] sm:$0xff]  ;;  %v124_v39 = vmul.f32 %v117_v2, %v1601_v27  ;;  %v134_v40 = vsel %vm126_vm1, %v122_v20, 0.0 }
  0x81   :  { %1095 = vmatprep.subr.bf16.mxu0 %v1422_v0  ;;  %v131_v35 = vadd.f32 %v130_v19, %v129_v24  ;;  %v1102_v41 = vpack.c.bf16 %v155_v29, %v154_v28  ;;  %v288_v42 = vrot.slane %v280_v25, %v1589_v13  ;;  %v295_v43 = vrot.slane %v281_v26, %v1589_v13  ;;  %v156_v45 = vld [vmem:[#allocation7 + $0x70] sm:$0xff]  ;;  %v157_v46 = vld [vmem:[#allocation7 + $0x78] sm:$0xff]  ;;  %v450_v59 = vld [vmem:[#allocation11 + $0x8] sm:$0xff] }
  0x82   :  { %v297_v47 = vcombine.low %v1581_v4, %v1591_v14  ;;  %v298_v48 = vcombine.low %v1601_v27, %v1606_v33  ;;  %v125_v49 = vmul.f32 %v117_v2, %v1606_v33  ;;  %v136_v50 = vsel %vm126_vm1, %v123_v30, 0.0  ;;  %v451_v8 = vld [vmem:[#allocation11 + $0x10] sm:$0xff]  ;;  %v452_v9 = vld [vmem:[#allocation11 + $0x18] sm:$0xff]  ;;  %v453_v15 = vld [vmem:[#allocation11 + $0x20] sm:$0xff] }
  0x83   :  { %1126 = vmatpush1.bf16.msra.mxu1 %v1125_v55  ;;  %v133_v44 = vadd.f32 %v132_v31, %v131_v35  ;;  %v1137_v51 = vpack.c.bf16 %v262_v38, %v260_v37  ;;  %v449_v55 = vld [vmem:[#allocation11] sm:$0xff]  ;;  %v296_v61 = vcombine.low %v288_v42, %v295_v43  ;;  %v1105_v62 = vpack.c.bf16 %v157_v46, %v156_v45  ;;  %v454_v16 = vld [vmem:[#allocation11 + $0x28] sm:$0xff]  ;;  %v455_v18 = vld [vmem:[#allocation11 + $0x30] sm:$0xff] }
  0x84   :  { %1128 = vmatprep.subr.bf16.mxu1 %v1127_v60  ;;  %1097 = vmatpush3.bf16.msra.mxu0 %v1096_v3  ;;  %v138_v60 = vsel %vm126_vm1, %v124_v39, 0.0  ;;  %v305_v3 = vrot.slane %v297_v47, %v1589_v13  ;;  %v312_v2 = vrot.slane %v298_v48, %v1589_v13  ;;  %v140_v5 = vsel %vm126_vm1, %v125_v49, 0.0  ;;  %v456_v19 = vld [vmem:[#allocation11 + $0x38] sm:$0xff]  ;;  %v458_v22 = vld [vmem:[#allocation11 + $0x48] sm:$0xff]  ;;  %v459_v24 = vld [vmem:[#allocation11 + $0x50] sm:$0xff] }
  0x85   :  { %1098 = vmatprep.subr.bf16.mxu0 %v1422_v0  ;;  %v135_v52 = vadd.f32 %v134_v40, %v133_v44  ;;  %v1139_v6 = vpack.c.bf16 %v450_v59, %v449_v55  ;;  %v1147_v17 = vpack.c.bf16 %v454_v16, %v453_v15  ;;  %v1151_v20 = vpack.c.bf16 %v456_v19, %v455_v18  ;;  %v460_v25 = vld [vmem:[#allocation11 + $0x58] sm:$0xff]  ;;  %v461_v28 = vld [vmem:[#allocation11 + $0x60] sm:$0xff]  ;;  %v463_v30 = vld [vmem:[#allocation11 + $0x70] sm:$0xff] }
  0x86   :  { %v1159_v26 = vpack.c.bf16 %v460_v25, %v459_v24  ;;  %v464_v31 = vld [vmem:[#allocation11 + $0x78] sm:$0xff]  ;;  %v266_v35 = vsub.s32 2, %v1565_v34  ;;  %v160_v38 = vsub.s32 1, %v1565_v34 }
  0x87   :  { %1130 = vmatpush1.bf16.msra.mxu1 %v1129_v11  ;;  %v137_v63 = vadd.f32 %v136_v50, %v135_v52  ;;  %v313_v11 = vcombine.low %v305_v3, %v312_v2 }
  0x88   :  { %1132 = vmatprep.subr.bf16.mxu1 %v1131_v12  ;;  %1100 = vmatpush3.bf16.msra.mxu0 %v1099_v21  ;;  %v1143_v12 = vpack.c.bf16 %v452_v9, %v451_v8  ;;  %v457_v21 = vld [vmem:[#allocation11 + $0x40] sm:$0xff]  ;;  %v267_v37 = vrot.slane %v1578_v58, %v266_v35  ;;  %v161_v43 = vrot.slane %v1578_v58, %v160_v38 }
  0x89   :  { %1101 = vmatprep.subr.bf16.mxu0 %v1422_v0  ;;  %v139_v7 = vadd.f32 %v138_v60, %v137_v63  ;;  %v1155_v23 = vpack.c.bf16 %v458_v22, %v457_v21 }
  0x8b   :  { %1134 = vmatpush1.bf16.msra.mxu1 %v1133_v32  ;;  %v141_v10 = vadd.f32 %v140_v5, %v139_v7  ;;  %v1167_v32 = vpack.c.bf16 %v464_v31, %v463_v30  ;;  %v725_v31 = vld [vmem:[#allocation10 + $0x10] sm:$0xff] }
  0x8c   :  { %1136 = vmatprep.subr.bf16.mxu1 %v1135_v36  ;;  %1103 = vmatpush3.bf16.msra.mxu0 %v1102_v41  ;;  %v113_v36 = vld [vmem:[#allocation5 + $0x8] sm:$0xff] }
  0x8d   :  { %1104 = vmatprep.subr.bf16.mxu0 %v1422_v0  ;;  %v271_v39 = vrot.slane %v113_v36, %v266_v35  ;;  %v727_v36 = vld [vmem:[#allocation10 + $0x20] sm:$0xff] }
  0x8f   :  { %1138 = vmatpush1.bf16.msra.mxu1 %v1137_v51 }
  0x90   :  { %1171 = vmatprep.subr.bf16.mxu1 %v1422_v0  ;;  %1106 = vmatpush3.bf16.msra.mxu0 %v1105_v62 }
  0x91   :  { %1140 = vmatprep.subr.bf16.mxu0 %v1139_v6 }
  0x92   :  { %381 = vmatmul.mubr.f32.vlgmr.msra.gmra.mrb[0].mxu1 %v296_v61 }
  0x93   :  { %386 = vmatprep.mubr.f32.mxu1 %v1423_v1  ;;  %1011 = vmatmul.mubr.f32.vlgmr.msra.gmra.mrb[0].mxu0 %v141_v10 }
  0x94   :  { %1142 = vmatpush3.bf16.msra.mxu0 %v1139_v6 }
  0x95   :  { %1144 = vmatprep.subr.bf16.mxu0 %v1143_v12 }
  0x96   :  { %387 = vmatmul.mubr.f32.gmra.mrb[2].mxu1 %v313_v11 }
  0x97   :  { %1080 = vmatprep.mubr.msk.f32.mxu1 %vm1424_vm0, %v1423_v1  ;;  %v462_v1 = vld [vmem:[#allocation11 + $0x68] sm:$0xff] }
  0x98   :  { %1146 = vmatpush3.bf16.msra.mxu0 %v1143_v12  ;;  %v1163_v29 = vpack.c.bf16 %v462_v1, %v461_v28  ;;  %v723_v1 = vld [vmem:[#allocation10] sm:$0xff] }
  0x99   :  { %1148 = vmatprep.subr.bf16.mxu0 %v1147_v17 }
  0x9c   :  { %1150 = vmatpush3.bf16.msra.mxu0 %v1147_v17 }
  0x9d   :  { %1152 = vmatprep.subr.bf16.mxu0 %v1151_v20 }
  0xa0   :  { %1154 = vmatpush3.bf16.msra.mxu0 %v1151_v20 }
  0xa1   :  { %1156 = vmatprep.subr.bf16.mxu0 %v1155_v23 }
  0xa4   :  { %1158 = vmatpush3.bf16.msra.mxu0 %v1155_v23 }
  0xa5   :  { %1160 = vmatprep.subr.bf16.mxu0 %v1159_v26 }
  0xa8   :  { %1162 = vmatpush3.bf16.msra.mxu0 %v1159_v26 }
  0xa9   :  { %1164 = vmatprep.subr.bf16.mxu0 %v1163_v29 }
  0xac   :  { %1166 = vmatpush3.bf16.msra.mxu0 %v1163_v29  ;;  %v724_v29 = vld [vmem:[#allocation10 + $0x8] sm:$0xff] }
  0xad   :  { %1168 = vmatprep.subr.bf16.mxu0 %v1167_v32  ;;  %v1172_v30 = vpack.c.bf16 %v724_v29, %v723_v1 }
  0xaf   :  { %1173 = vmatpush3.bf16.msra.mxu1 %v1172_v30 }
  0xb0   :  { %1170 = vmatpush3.bf16.msra.mxu0 %v1167_v32  ;;  %1174 = vmatprep.subr.bf16.mxu1 %v1422_v0  ;;  %v726_v32 = vld [vmem:[#allocation10 + $0x18] sm:$0xff] }
  0xb1   :  { %v1175_v35 = vpack.c.bf16 %v726_v32, %v725_v31 }
  0xb3   :  { %1176 = vmatpush3.bf16.msra.mxu1 %v1175_v35 }
  0xb4   :  { %1177 = vmatprep.subr.bf16.mxu1 %v1422_v0 }
 0x165   :  { %v382_v40 = vpop.f32.mrb[0].mxu1 }
 0x166   :  { %v383_v41 = vadd.f32 %v382_v40, %v267_v37  ;;  %v384_v42 = vpop.f32.mrb[1].mxu1  ;;  %v228_v45 = vpop.f32.mrb[0].mxu0  ;;  %v730_v40 = vld [vmem:[#allocation10 + $0x38] sm:$0xff] }
 0x167   :  { %v385_v44 = vadd.f32 %v384_v42, %v271_v39  ;;  %v1012_v46 = vpop.f32.mrb[1].mxu0  ;;  %v229_v51 = vadd.f32 %v228_v45, %v161_v43  ;;  %v731_v42 = vld [vmem:[#allocation10 + $0x40] sm:$0xff]  ;;  %v732_v43 = vld [vmem:[#allocation10 + $0x48] sm:$0xff]  ;;  %v733_v45 = vld [vmem:[#allocation10 + $0x50] sm:$0xff] }
 0x168   :  { %v734_v46 = vld [vmem:[#allocation10 + $0x58] sm:$0xff] }
 0x169   :  { %v397_v47 = vcombine.low %v383_v41, %v385_v44  ;;  %v398_v48 = vcombine.high %v383_v41, %v385_v44  ;;  %v388_v49 = vpop.f32.mrb[2].mxu1  ;;  %v1184_v44 = vpack.c.bf16 %v732_v43, %v731_v42 }
 0x16a   :  { %v389_v50 = vadd.f32 %v388_v49, %v267_v37  ;;  %v390_v52 = vpop.f32.mrb[3].mxu1  ;;  %v728_v37 = vld [vmem:[#allocation10 + $0x28] sm:$0xff] }
 0x16b   :  { %v1633_v55 = vrot.slane %v397_v47, %v1589_v13  ;;  %v1636_v59 = vrot.slane %v398_v48, %v1589_v13  ;;  %v391_v60 = vadd.f32 %v390_v52, %v271_v39  ;;  %v1178_v38 = vpack.c.bf16 %v728_v37, %v727_v36  ;;  %v729_v39 = vld [vmem:[#allocation10 + $0x30] sm:$0xff]  ;;  %v735_v48 = vld [vmem:[#allocation10 + $0x60] sm:$0xff]  ;;  %v736_v49 = vld [vmem:[#allocation10 + $0x68] sm:$0xff] }
 0x16c   :  { %v1181_v41 = vpack.c.bf16 %v730_v40, %v729_v39  ;;  %v1187_v47 = vpack.c.bf16 %v734_v46, %v733_v45  ;;  %v738_v52 = vld [vmem:[#allocation10 + $0x78] sm:$0xff] }
 0x16d   :  { %v1640_v61 = vcombine.high %v1633_v55, %v1633_v55  ;;  %v1644_v62 = vcombine.high %v1636_v59, %v1636_v59  ;;  %v415_v63 = vcombine.low %v389_v50, %v391_v60  ;;  %v416_v3 = vcombine.high %v389_v50, %v391_v60  ;;  %1179 = vmatpush3.bf16.msra.mxu1 %v1178_v38 }
 0x16e   :  { %v441_v2 = vmul.f32 %v1633_v55, %v229_v51  ;;  %v443_v5 = vmul.f32 %v1636_v59, %v229_v51  ;;  %1180 = vmatprep.subr.bf16.mxu1 %v1422_v0  ;;  %v1190_v50 = vpack.c.bf16 %v736_v49, %v735_v48 }
 0x16f   :  { %v442_v6 = vmul.f32 %v1640_v61, %v229_v51  ;;  %v444_v7 = vmul.f32 %v1644_v62, %v229_v51  ;;  %v1651_v8 = vrot.slane %v415_v63, %v1589_v13  ;;  %v1654_v9 = vrot.slane %v416_v3, %v1589_v13 }
 0x171   :  { %v473_v10 = vcombine.low %v441_v2, %v442_v6  ;;  %v474_v11 = vcombine.low %v443_v5, %v444_v7  ;;  %v1658_v12 = vcombine.high %v1651_v8, %v1651_v8  ;;  %v1662_v15 = vcombine.high %v1654_v9, %v1654_v9  ;;  %1182 = vmatpush3.bf16.msra.mxu1 %v1181_v41 }
 0x172   :  { %v445_v16 = vmul.f32 %v1651_v8, %v229_v51  ;;  %v447_v17 = vmul.f32 %v1654_v9, %v229_v51  ;;  %1183 = vmatprep.subr.bf16.mxu1 %v1422_v0 }
 0x173   :  { %v481_v18 = vrot.slane %v473_v10, %v1589_v13  ;;  %v488_v19 = vrot.slane %v474_v11, %v1589_v13  ;;  %v446_v20 = vmul.f32 %v1658_v12, %v229_v51  ;;  %v448_v21 = vmul.f32 %v1662_v15, %v229_v51  ;;  %v737_v51 = vld [vmem:[#allocation10 + $0x70] sm:$0xff] }
 0x174   :  { %v1193_v60 = vpack.c.bf16 %v738_v52, %v737_v51  ;;  %v682_v51 = vrot.slane %v1633_v55, 2 }
 0x175   :  { %v489_v22 = vcombine.low %v481_v18, %v488_v19  ;;  %v490_v23 = vcombine.low %v445_v16, %v446_v20  ;;  %v491_v24 = vcombine.low %v447_v17, %v448_v21  ;;  %1185 = vmatpush3.bf16.msra.mxu1 %v1184_v44 }
 0x176   :  { %1186 = vmatprep.subr.bf16.mxu1 %v1422_v0 }
 0x177   :  { %1045 = vmatprep.mubr.f32.mxu0 %v489_v22  ;;  %v498_v25 = vrot.slane %v490_v23, %v1589_v13  ;;  %v505_v26 = vrot.slane %v491_v24, %v1589_v13 }
 0x179   :  { %v506_v28 = vcombine.low %v498_v25, %v505_v26  ;;  %1188 = vmatpush3.bf16.msra.mxu1 %v1187_v47 }
 0x17a   :  { %1189 = vmatprep.subr.bf16.mxu1 %v1422_v0 }
 0x17b   :  { %1046 = vmatmul.mubr.f32.vlgmr.msra.gmra.mrb[2].mxu0 %v506_v28 }
 0x17d   :  { %1191 = vmatpush3.bf16.msra.mxu1 %v1190_v50 }
 0x17e   :  { %1192 = vmatprep.subr.bf16.mxu1 %v1422_v0 }
 0x181   :  { %1194 = vmatpush3.bf16.msra.mxu1 %v1193_v60  ;;  %v683_v60 = vrot.slane %v1640_v61, 2 }
 0x24e   :  { %v1047_v63 = vpop.f32.mrb[2].mxu0 }
 0x24f   :  { %v603_v3 = vcombine.high %v1047_v63, %v1047_v63  ;;  %v610_v2 = vrot.slane %v1047_v63, %v1589_v13  ;;  %v575_v5 = vpop.f32.mrb[3].mxu0 }
 0x250   :  { %v586_v6 = vcombine.high %v575_v5, %v575_v5  ;;  %v593_v7 = vrot.slane %v575_v5, %v1589_v13 }
 0x251   :  { %v617_v10 = vrot.slane %v603_v3, %v1589_v13  ;;  %v618_v11 = vcombine.high %v610_v2, %v610_v2  ;;  %v632_v16 = vsel %vm126_vm1, %v610_v2, -inf  ;;  %v684_v3 = vrot.slane %v1636_v59, 2 }
 0x252   :  { %v600_v17 = vrot.slane %v586_v6, %v1589_v13  ;;  %v601_v18 = vcombine.high %v593_v7, %v593_v7  ;;  %v628_v19 = vsel %vm126_vm1, %v593_v7, -inf }
 0x253   :  { %v619_v0 = vcombine.high %v617_v10, %v617_v10  ;;  %v634_v20 = vsel %vm126_vm1, %v618_v11, -inf  ;;  %v636_v21 = vsel %vm126_vm1, %v617_v10, -inf  ;;  %v633_v22 = vmax.f32 %v628_v19, %v632_v16 }
 0x254   :  { %v602_v23 = vcombine.high %v600_v17, %v600_v17  ;;  %v629_v24 = vsel %vm126_vm1, %v601_v18, -inf  ;;  %v630_v25 = vsel %vm126_vm1, %v600_v17, -inf }
 0x255   :  { %v638_v26 = vsel %vm126_vm1, %v619_v0, -inf  ;;  %v635_v28 = vmax.f32 %v629_v24, %v634_v20  ;;  %v637_v1 = vmax.f32 %v630_v25, %v636_v21 }
 0x256   :  { %v631_v13 = vsel %vm126_vm1, %v602_v23, -inf }
 0x257   :  { %v639_v29 = vmax.f32 %v631_v13, %v638_v26  ;;  %v640_v30 = vmax.f32 %v633_v22, %v635_v28 }
 0x259   :  { %v641_v31 = vmax.f32 %v637_v1, %v639_v29 }
 0x25b   :  { %v642_v32 = vmax.f32 %v640_v30, %v641_v31 }
 0x25d   :  { %v643_v35 = vsub.f32 %v593_v7, %v642_v32  ;;  %v644_v36 = vsub.f32 %v601_v18, %v642_v32  ;;  %v645_v37 = vsub.f32 %v600_v17, %v642_v32  ;;  %v646_v38 = vsub.f32 %v602_v23, %v642_v32 }
 0x25e   :  { %v647_v39 = vsub.f32 %v610_v2, %v642_v32  ;;  %v648_v40 = vsub.f32 %v618_v11, %v642_v32  ;;  %v649_v41 = vsub.f32 %v617_v10, %v642_v32  ;;  %v650_v42 = vsub.f32 %v619_v0, %v642_v32 }
 0x25f   :  { %v651_v43 = vmul.f32 1.442695, %v643_v35  ;;  %v653_v44 = vmul.f32 1.442695, %v644_v36  ;;  %v655_v45 = vmul.f32 1.442695, %v645_v37 }
 0x260   :  { %v657_v46 = vmul.f32 1.442695, %v646_v38  ;;  %v659_v47 = vmul.f32 1.442695, %v647_v39  ;;  %v661_v48 = vmul.f32 1.442695, %v648_v40 }
 0x261   :  { %1212 = vpow2.f32 %v651_v43  ;;  %v663_v49 = vmul.f32 1.442695, %v649_v41  ;;  %v665_v50 = vmul.f32 1.442695, %v650_v42  ;;  %v685_v7 = vrot.slane %v1644_v62, 2 }
 0x262   :  { %1214 = vpow2.f32 %v653_v44  ;;  %v686_v17 = vrot.slane %v1651_v8, 2  ;;  %v687_v0 = vrot.slane %v1658_v12, 2  ;;  %v688_v62 = vrot.slane %v1654_v9, 2 }
 0x263   :  { %1216 = vpow2.f32 %v655_v45  ;;  %v689_v23 = vrot.slane %v1662_v15, 2 }
 0x264   :  { %1218 = vpow2.f32 %v657_v46 }
 0x265   :  { %1220 = vpow2.f32 %v659_v47 }
 0x266   :  { %1222 = vpow2.f32 %v661_v48 }
 0x267   :  { %1224 = vpow2.f32 %v663_v49 }
 0x268   :  { %1226 = vpow2.f32 %v665_v50 }
 0x26b   :  { %v1213_v52 = vpop.eup %1212 }
 0x26c   :  { %v1215_v63 = vpop.eup %1214  ;;  %v667_v2 = vsel %vm126_vm1, %v1213_v52, 0.0  ;;  %v698_v5 = vmul.f32 %v1213_v52, %v682_v51 }
 0x26d   :  { %v1217_v6 = vpop.eup %1216  ;;  %v668_v10 = vsel %vm126_vm1, %v1215_v63, 0.0  ;;  %v699_v11 = vmul.f32 %v1215_v63, %v683_v60  ;;  %v741_v60 = vsub.s32 3, %v1565_v34 }
 0x26e   :  { %v1219_v16 = vpop.eup %1218  ;;  %v669_v18 = vadd.f32 %v668_v10, %v667_v2  ;;  %v700_v55 = vmul.f32 %v1217_v6, %v684_v3  ;;  %v706_v19 = vsel %vm126_vm1, %v698_v5, 0.0  ;;  %v670_v59 = vsel %vm126_vm1, %v1217_v6, 0.0 }
 0x26f   :  { %v1221_v61 = vpop.eup %1220  ;;  %v701_v20 = vmul.f32 %v1219_v16, %v685_v7  ;;  %v707_v21 = vsel %vm126_vm1, %v699_v11, 0.0  ;;  %v672_v26 = vsel %vm126_vm1, %v1219_v16, 0.0  ;;  %v742_v63 = vrot.slane %v1578_v58, %v741_v60 }
 0x270   :  { %v1223_v22 = vpop.eup %1222  ;;  %v671_v24 = vadd.f32 %v670_v59, %v669_v18  ;;  %v708_v25 = vadd.f32 %v707_v21, %v706_v19  ;;  %v709_v28 = vsel %vm126_vm1, %v700_v55, 0.0  ;;  %v702_v1 = vmul.f32 %v1221_v61, %v686_v17 }
 0x271   :  { %v1225_v8 = vpop.eup %1224  ;;  %v703_v13 = vmul.f32 %v1223_v22, %v687_v0  ;;  %v674_v32 = vsel %vm126_vm1, %v1221_v61, 0.0  ;;  %v711_v9 = vsel %vm126_vm1, %v701_v20, 0.0  ;;  %v676_v37 = vsel %vm126_vm1, %v1223_v22, 0.0 }
 0x272   :  { %v1227_v12 = vpop.eup %1226  ;;  %v673_v29 = vadd.f32 %v672_v26, %v671_v24  ;;  %v710_v30 = vadd.f32 %v709_v28, %v708_v25  ;;  %v704_v31 = vmul.f32 %v1225_v8, %v688_v62  ;;  %v713_v38 = vsel %vm126_vm1, %v702_v1, 0.0 }
 0x273   :  { %v705_v35 = vmul.f32 %v1227_v12, %v689_v23  ;;  %v678_v41 = vsel %vm126_vm1, %v1225_v8, 0.0  ;;  %v715_v42 = vsel %vm126_vm1, %v703_v13, 0.0  ;;  %v680_v45 = vsel %vm126_vm1, %v1227_v12, 0.0 }
 0x274   :  { %v675_v36 = vadd.f32 %v674_v32, %v673_v29  ;;  %v712_v15 = vadd.f32 %v711_v9, %v710_v30  ;;  %v717_v46 = vsel %vm126_vm1, %v704_v31, 0.0 }
 0x275   :  { %v719_v49 = vsel %vm126_vm1, %v705_v35, 0.0 }
 0x276   :  { %v677_v39 = vadd.f32 %v676_v37, %v675_v36  ;;  %v714_v40 = vadd.f32 %v713_v38, %v712_v15  ;;  %v888_v15 = vsub.s32 4, %v1565_v34 }
 0x278   :  { %v679_v43 = vadd.f32 %v678_v41, %v677_v39  ;;  %v716_v44 = vadd.f32 %v715_v42, %v714_v40 }
 0x27a   :  { %v681_v47 = vadd.f32 %v680_v45, %v679_v43  ;;  %v718_v48 = vadd.f32 %v717_v46, %v716_v44  ;;  %v889_v43 = vrot.slane %v1578_v58, %v888_v15 }
 0x27c   :  { %v720_v50 = vadd.f32 %v719_v49, %v718_v48  ;;  %1228 = vrcp.f32 %v681_v47 }
 0x286   :  { %v1229_v51 = vpop.eup %1228 }
 0x287   :  { %v722_v52 = vmul.f32 %v1229_v51, %v720_v50 }
 0x289   :  { %1081 = vmatmul.mubr.f32.vlgmr.msra.gmra.mrb[4].mxu1 %v722_v52 }
 0x35c   :  { %v809_v3 = vpop.f32.mrb[4].mxu1 }
 0x35d   :  { %v810_v2 = vadd.f32 %v809_v3, %v742_v63  ;;  %v1082_v5 = vpop.f32.mrb[5].mxu1 }
 0x35f   :  { %v1718_v6 = vadd.f32 %v810_v2, %v1574_v56  ;;  %v1721_v7 = vadd.f32 %v810_v2, %v1570_v53  ;;  %v1724_v10 = vadd.f32 %v810_v2, %v1576_v57  ;;  %v1727_v11 = vadd.f32 %v810_v2, %v1572_v54 }
 0x360   :  { %v1734_v18 = vadd.f32 %v810_v2, %v1591_v14  ;;  %v1737_v56 = vadd.f32 %v810_v2, %v1581_v4  ;;  %v1746_v19 = vadd.f32 %v810_v2, %v1606_v33  ;;  %v1749_v14 = vadd.f32 %v810_v2, %v1601_v27 }
 0x361   :  { %v823_v16 = vmul.f32 %v1718_v6, %v1718_v6  ;;  %v821_v17 = vmul.f32 %v1721_v7, %v1721_v7  ;;  %v824_v54 = vmul.f32 %v1724_v10, %v1724_v10  ;;  %v822_v55 = vmul.f32 %v1727_v11, %v1727_v11 }
 0x362   :  { %v826_v0 = vmul.f32 %v1734_v18, %v1734_v18  ;;  %v825_v59 = vmul.f32 %v1737_v56, %v1737_v56  ;;  %v828_v27 = vmul.f32 %v1746_v19, %v1746_v19  ;;  %v827_v21 = vmul.f32 %v1749_v14, %v1749_v14 }
 0x363   :  { %v835_v53 = vsel %vm126_vm1, %v823_v16, 0.0  ;;  %v829_v57 = vsel %vm126_vm1, %v821_v17, 0.0  ;;  %v838_v4 = vsel %vm126_vm1, %v824_v54, 0.0  ;;  %v832_v61 = vsel %vm126_vm1, %v822_v55, 0.0 }
 0x364   :  { %836 = vadd.xlane.f32.xlu1 %v835_v53  ;;  %830 = vadd.xlane.f32.xlu0 %v829_v57  ;;  %v844_v20 = vsel %vm126_vm1, %v826_v0, 0.0  ;;  %v841_v33 = vsel %vm126_vm1, %v825_v59, 0.0  ;;  %v850_v22 = vsel %vm126_vm1, %v828_v27, 0.0  ;;  %v847_v62 = vsel %vm126_vm1, %v827_v21, 0.0 }
 0x368   :  { %839 = vadd.xlane.f32.xlu1 %v838_v4  ;;  %833 = vadd.xlane.f32.xlu0 %v832_v61 }
 0x36c   :  { %845 = vadd.xlane.f32.xlu1 %v844_v20  ;;  %842 = vadd.xlane.f32.xlu0 %v841_v33 }
 0x370   :  { %851 = vadd.xlane.f32.xlu1 %v850_v22  ;;  %848 = vadd.xlane.f32.xlu0 %v847_v62 }
 0x3f1   :  { %v837_v23 = vpop.xlane.xlu1 %836  ;;  %v831_v24 = vpop.xlane.xlu0 %830 }
 0x3f2   :  { %v856_v25 = vmul.f32 0.0078125, %v837_v23  ;;  %v854_v8 = vmul.f32 0.0078125, %v831_v24 }
 0x3f4   :  { %v864_v26 = vadd.f32 1e-08, %v856_v25  ;;  %v862_v28 = vadd.f32 1e-08, %v854_v8 }
 0x3f5   :  { %v840_v1 = vpop.xlane.xlu1 %839  ;;  %v834_v13 = vpop.xlane.xlu0 %833 }
 0x3f6   :  { %1230 = vrsqrt.f32 %v864_v26  ;;  %v857_v12 = vmul.f32 0.0078125, %v840_v1  ;;  %v855_v29 = vmul.f32 0.0078125, %v834_v13 }
 0x3f7   :  { %1232 = vrsqrt.f32 %v862_v28 }
 0x3f8   :  { %v865_v30 = vadd.f32 1e-08, %v857_v12  ;;  %v863_v31 = vadd.f32 1e-08, %v855_v29 }
 0x3f9   :  { %v846_v32 = vpop.xlane.xlu1 %845  ;;  %v843_v35 = vpop.xlane.xlu0 %842 }
 0x3fa   :  { %1234 = vrsqrt.f32 %v865_v30  ;;  %v859_v9 = vmul.f32 0.0078125, %v846_v32  ;;  %v858_v36 = vmul.f32 0.0078125, %v843_v35 }
 0x3fb   :  { %1236 = vrsqrt.f32 %v863_v31 }
 0x3fc   :  { %v867_v37 = vadd.f32 1e-08, %v859_v9  ;;  %v866_v38 = vadd.f32 1e-08, %v858_v36 }
 0x3fd   :  { %v852_v39 = vpop.xlane.xlu1 %851  ;;  %v849_v40 = vpop.xlane.xlu0 %848 }
 0x3fe   :  { %1238 = vrsqrt.f32 %v867_v37  ;;  %v861_v41 = vmul.f32 0.0078125, %v852_v39  ;;  %v860_v42 = vmul.f32 0.0078125, %v849_v40 }
 0x3ff   :  { %1240 = vrsqrt.f32 %v866_v38 }
 0x400   :  { %v1231_v44 = vpop.eup %1230  ;;  %v869_v45 = vadd.f32 1e-08, %v861_v41  ;;  %v868_v46 = vadd.f32 1e-08, %v860_v42 }
 0x401   :  { %v1233_v47 = vpop.eup %1232  ;;  %v880_v48 = vmul.f32 %v1231_v44, %v1718_v6 }
 0x402   :  { %v878_v49 = vmul.f32 %v1233_v47, %v1721_v7  ;;  %1242 = vrsqrt.f32 %v869_v45 }
 0x403   :  { %v892_v34 = vmul.f32 %v889_v43, %v880_v48  ;;  %1244 = vrsqrt.f32 %v868_v46 }
 0x404   :  { %v1235_v50 = vpop.eup %1234  ;;  %v890_v51 = vmul.f32 %v889_v43, %v878_v49 }
 0x405   :  { %v1237_v52 = vpop.eup %1236  ;;  %900 = vst [vmem:[#allocation13 + $0x4] sm:$0x3] %v892_v34  ;;  %v881_v60 = vmul.f32 %v1235_v50, %v1724_v10 }
 0x406   :  { %898 = vst [vmem:[#allocation13] sm:$0x3] %v890_v51  ;;  %v879_v58 = vmul.f32 %v1237_v52, %v1727_v11 }
 0x407   :  { %v893_v63 = vmul.f32 %v889_v43, %v881_v60 }
 0x408   :  { %v1239_v3 = vpop.eup %1238  ;;  %v891_v2 = vmul.f32 %v889_v43, %v879_v58 }
 0x409   :  { %v1241_v5 = vpop.eup %1240  ;;  %901 = vst [vmem:[#allocation13 + $0x6] sm:$0x3] %v893_v63  ;;  %v883_v6 = vmul.f32 %v1239_v3, %v1734_v18 }
 0x40a   :  { %899 = vst [vmem:[#allocation13 + $0x2] sm:$0x3] %v891_v2  ;;  %v882_v7 = vmul.f32 %v1241_v5, %v1737_v56 }
 0x40b   :  { %v895_v16 = vmul.f32 %v889_v43, %v883_v6 }
 0x40c   :  { %v1243_v17 = vpop.eup %1242  ;;  %v894_v53 = vmul.f32 %v889_v43, %v882_v7 }
 0x40d   :  { %v1245_v57 = vpop.eup %1244  ;;  %903 = vst [vmem:[#allocation13 + $0xa] sm:$0x3] %v895_v16  ;;  %v885_v10 = vmul.f32 %v1243_v17, %v1746_v19 }
 0x40e   :  { %902 = vst [vmem:[#allocation13 + $0x8] sm:$0x3] %v894_v53  ;;  %v884_v11 = vmul.f32 %v1245_v57, %v1749_v14 }
 0x40f   :  { %v897_v54 = vmul.f32 %v889_v43, %v885_v10 }
 0x410   :  { %v896_v55 = vmul.f32 %v889_v43, %v884_v11 }
 0x411   :  { %905 = vst [vmem:[#allocation13 + $0xe] sm:$0x3] %v897_v54 }
 0x412   :  { %904 = vst [vmem:[#allocation13 + $0xc] sm:$0x3] %v896_v55 }
 0x413   :  { %1389 = shalt.err (!%p1386_p10)
}
 0x414   :  { %s1390_s25 = scalar_lea.hbm %s1796_s6, 256 }
 0x415   :  { %p1391_p11 = scmp.ne.s32.totalorder %s1796_s6, %s1390_s25  ;;  %p1394_p12 = scmp.lt.u32.totalorder %s1390_s25, %s1796_s6 }
 0x417   :  { %p1396_p13 = pnand %p1394_p12, %p1391_p11 }
 0x419   :  { %1399 = shalt.err (!%p1396_p13)
}
 0x41a   :  { %917 = dma.vmem_to_hbm [thread:$0]  %s912_s0, 256, %s1796_s6, [#allocation4], %s1415_s3, %s1415_s3, %s1416_s24  }
 0x41b   :  { %1408 = dma.done.wait [#allocation4], 256  }
 0x41c   :  { %1409 = vsyncadd [#allocation4], 4294967040 }
 0x41d   :  { %921 = vsyncpa [#allocation3], 1 }
 0x41e   :  { %922 = vsyncpa [#allocation6], 1 }
 0x41f   :  { %923 = vsyncpa [#allocation9], 1 }
 0x420   :  { %924 = vsyncpa [#allocation12], 1 }
 0x421   :  { %925 = vsyncpa [#allocation4], 1 }

</bundles_post_ra>
